<compile_context>
chip_gen: v5e
topology: v5e:2x2
jax: 0.10.0
libtpu: 0.0.40
codegen_flags: <defaults>
</compile_context>

<pallas_src>
import functools

import jax
import jax.numpy as jnp
from jax.experimental import pallas as pl
from jax.experimental.pallas import tpu as pltpu

D_IN, D_H1, D_H2, D_OUT = 768, 128, 64, 4
D_H2_PAD = 128          # hidden-2 padded to a full 128-lane width (zero columns)
_BM_VMEM_CAP = 2048     # 2 x (x + out) tiles ~ 12.6 MB at bm=2048 -> safe for v5e's 16 MiB scoped VMEM


def _round_up(n, m):
    return ((n + m - 1) // m) * m


def _cdiv(a, b):
    return (a + b - 1) // b


def actionnet_kernel(x_ref, w1_ref, b1_ref, w2_ref, b2_ref, w3_ref, b3_ref, o_ref):
    # x arrives in the caller's dtype (f32) straight from HBM; cast to bf16 on
    # the VPU so all three matmuls take the native bf16 MXU path with f32
    # accumulation. Biases stay f32.
    x = x_ref[...].astype(jnp.bfloat16)                                   # (bm, 768)
    h1 = jnp.dot(x, w1_ref[...], preferred_element_type=jnp.float32)      # (bm, 128)
    h1 = jnp.maximum(h1 + b1_ref[...], 0.0).astype(jnp.bfloat16)
    h2 = jnp.dot(h1, w2_ref[...], preferred_element_type=jnp.float32)     # (bm, 128) = 64 real + 64 zero-pad
    h2 = jnp.maximum(h2 + b2_ref[...], 0.0).astype(jnp.bfloat16)
    out = jnp.dot(h2, w3_ref[...], preferred_element_type=jnp.float32)    # (bm, 4)
    o_ref[...] = out + b3_ref[...]


def prepare_params(params):
    """One-time cast / zero-pad of the weights (hoisted out of the forward)."""
    w1, b1, w2, b2, w3, b3 = params
    w1p = jnp.asarray(w1, jnp.bfloat16)                                              # (768, 128)
    b1p = jnp.asarray(b1, jnp.float32).reshape(1, D_H1)                              # (1, 128)
    w2p = (jnp.zeros((D_H1, D_H2_PAD), jnp.bfloat16)
           .at[:, :D_H2].set(jnp.asarray(w2, jnp.bfloat16)))                         # (128, 128)
    b2p = (jnp.zeros((1, D_H2_PAD), jnp.float32)
           .at[:, :D_H2].set(jnp.asarray(b2, jnp.float32).reshape(1, D_H2)))         # (1, 128)
    w3p = (jnp.zeros((D_H2_PAD, D_OUT), jnp.bfloat16)
           .at[:D_H2, :].set(jnp.asarray(w3, jnp.bfloat16)))                         # (128, 4)
    b3p = jnp.asarray(b3, jnp.float32).reshape(1, D_OUT)                             # (1, 4)
    return (w1p, b1p, w2p, b2p, w3p, b3p)


@functools.partial(jax.jit, static_argnames=("bm",))
def actionnet_forward(x, prepared_params, *, bm=1024):
    """x: (B, C, H, W) or (B, 768). Returns (B, 4) float32."""
    w1p, b1p, w2p, b2p, w3p, b3p = prepared_params
    B = x.shape[0]
    x2d = x.reshape(B, -1)                       # row-major flatten == torch .view
    assert x2d.shape[1] == D_IN, f"expected {D_IN} features, got {x2d.shape[1]}"

    # Batch tile: multiple of 16 (bf16 sublane packing), no larger than the
    # 16-rounded batch, capped so double-buffered x/out tiles fit v5e's 16 MiB
    # scoped VMEM (also well under v7x's 64 MiB physical VMEM).
    bm_eff = min(_round_up(max(bm, 16), 16), _BM_VMEM_CAP, _round_up(B, 16))
    # v7x megacore: for big batches make sure grid >= 2 so both TensorCores
    # get work (weights are ~230 KB, duplicating them per core is free).
    if B > 512:
        bm_eff = min(bm_eff, _round_up(_cdiv(B, 2), 256))
    grid = (_cdiv(B, bm_eff),)   # partial last block handled by Pallas masking

    full = lambda shape: pl.BlockSpec(shape, lambda i: (0, 0))  # VMEM-resident weights/biases

    x_bytes = B * D_IN * x2d.dtype.itemsize
    w_bytes = 2 * (D_IN * D_H1 + D_H1 * D_H2_PAD + D_H2_PAD * D_OUT) \
        + 4 * (D_H1 + D_H2_PAD + D_OUT)
    out_bytes = B * D_OUT * 4
    cost = pl.CostEstimate(
        flops=2 * B * (D_IN * D_H1 + D_H1 * D_H2_PAD + D_H2_PAD * D_OUT),
        transcendentals=0,
        bytes_accessed=x_bytes + w_bytes + out_bytes,
    )

    out = pl.pallas_call(
        actionnet_kernel,
        out_shape=jax.ShapeDtypeStruct((B, D_OUT), jnp.float32),
        grid=grid,
        in_specs=[
            pl.BlockSpec((bm_eff, D_IN), lambda i: (i, 0)),   # x tile per grid step
            full((D_IN, D_H1)), full((1, D_H1)),
            full((D_H1, D_H2_PAD)), full((1, D_H2_PAD)),
            full((D_H2_PAD, D_OUT)), full((1, D_OUT)),
        ],
        out_specs=pl.BlockSpec((bm_eff, D_OUT), lambda i: (i, 0)),
        compiler_params=pltpu.CompilerParams(
            dimension_semantics=("parallel",),
        ),
        cost_estimate=cost,
    )(x2d, w1p, b1p, w2p, b2p, w3p, b3p)

    return out


def init_params(key):
    """Deterministic init mirroring nn.Linear; weights stored as (in, out)."""
    ks = jax.random.split(key, 6)

    def linear(kw, kb, fan_in, fan_out):
        bound = 1.0 / jnp.sqrt(jnp.float32(fan_in))  # PyTorch default U(-1/sqrt(fan_in), +)
        w = jax.random.uniform(kw, (fan_in, fan_out), jnp.float32, -bound, bound)
        b = jax.random.uniform(kb, (1, fan_out), jnp.float32, -bound, bound)
        return w, b

    w1, b1 = linear(ks[0], ks[1], D_IN, D_H1)
    w2, b2 = linear(ks[2], ks[3], D_H1, D_H2)
    w3, b3 = linear(ks[4], ks[5], D_H2, D_OUT)
    return (w1, b1, w2, b2, w3, b3)


def reference_forward(x, params):
    w1, b1, w2, b2, w3, b3 = params
    x2d = x.reshape(x.shape[0], -1).astype(jnp.float32)
    h1 = jnp.maximum(x2d @ w1 + b1, 0.0)
    h2 = jnp.maximum(h1 @ w2 + b2, 0.0)
    return h2 @ w3 + b3


if __name__ == "__main__":
    key = jax.random.PRNGKey(0)
    k_params, k_x = jax.random.split(key)

    params = init_params(k_params)
    prepped = jax.block_until_ready(prepare_params(params))  # one-time weight prep

    # NCHW input whose flatten has 768 features: (B, C, H, W) = (8, 3, 16, 16)
    x = jax.random.normal(k_x, (8, 3, 16, 16), jnp.float32)

    out = actionnet_forward(x, prepped)
    out = jax.block_until_ready(out)

    ref = reference_forward(x, params)
    assert out.shape == (8, 4), out.shape
    # bf16 weights / in-kernel bf16 x cast with f32 accumulation: ~1e-2 agreement.
    assert jnp.allclose(out, ref, atol=5e-2, rtol=5e-2), (
        f"max abs diff {jnp.max(jnp.abs(out - ref))}")

    print("KERNEL_OK")
</pallas_src>

<mosaic_0001>
module attributes {stable_mosaic.version = 11 : i64} {
  func.func @actionnet_kernel(%arg0: i32, %arg1: memref<16x768xf32, #tpu.memory_space<vmem>>, %arg2: memref<768x128xbf16, #tpu.memory_space<vmem>>, %arg3: memref<1x128xf32, #tpu.memory_space<vmem>>, %arg4: memref<128x128xbf16, #tpu.memory_space<vmem>>, %arg5: memref<1x128xf32, #tpu.memory_space<vmem>>, %arg6: memref<128x4xbf16, #tpu.memory_space<vmem>>, %arg7: memref<1x4xf32, #tpu.memory_space<vmem>>, %arg8: memref<16x4xf32, #tpu.memory_space<vmem>>) attributes {dimension_semantics = [#tpu.dimension_semantics<parallel>], iteration_bounds = array<i64: 1>, scalar_prefetch = 0 : i64, scratch_operands = 0 : i64, tpu.core_type = #tpu.core_type<tc>, window_params = [{transform_indices = @transform_0, window_bounds = array<i64: 16, 768>}, {pipeline_mode = #tpu.pipeline_mode<synchronous>, transform_indices = @transform_1, window_bounds = array<i64: 768, 128>}, {pipeline_mode = #tpu.pipeline_mode<synchronous>, transform_indices = @transform_2, window_bounds = array<i64: 1, 128>}, {pipeline_mode = #tpu.pipeline_mode<synchronous>, transform_indices = @transform_3, window_bounds = array<i64: 128, 128>}, {pipeline_mode = #tpu.pipeline_mode<synchronous>, transform_indices = @transform_4, window_bounds = array<i64: 1, 128>}, {pipeline_mode = #tpu.pipeline_mode<synchronous>, transform_indices = @transform_5, window_bounds = array<i64: 128, 4>}, {pipeline_mode = #tpu.pipeline_mode<synchronous>, transform_indices = @transform_6, window_bounds = array<i64: 1, 4>}, {transform_indices = @transform_7, window_bounds = array<i64: 16, 4>}]} {
    %c0 = arith.constant 0 : index
    %c0_0 = arith.constant 0 : index
    %0 = vector.load %arg1[%c0, %c0_0] : memref<16x768xf32, #tpu.memory_space<vmem>>, vector<16x768xf32>
    %1 = arith.truncf %0 : vector<16x768xf32> to vector<16x768xbf16>
    %c0_1 = arith.constant 0 : index
    %c0_2 = arith.constant 0 : index
    %2 = vector.load %arg2[%c0_1, %c0_2] : memref<768x128xbf16, #tpu.memory_space<vmem>>, vector<768x128xbf16>
    %cst = arith.constant dense<0.000000e+00> : vector<16x128xf32>
    %3 = tpu.matmul %1, %2, %cst {dimension_numbers = #tpu.dot_dimension_numbers<[1], [0], [0], [1], [0, 0, 1, 1], [], []>} : vector<16x768xbf16>, vector<768x128xbf16>, vector<16x128xf32> -> vector<16x128xf32>
    %c0_3 = arith.constant 0 : index
    %c0_4 = arith.constant 0 : index
    %4 = vector.load %arg3[%c0_3, %c0_4] : memref<1x128xf32, #tpu.memory_space<vmem>>, vector<1x128xf32>
    %5 = vector.broadcast %4 : vector<1x128xf32> to vector<16x128xf32>
    %6 = arith.addf %3, %5 : vector<16x128xf32>
    %cst_5 = arith.constant 0.000000e+00 : f32
    %7 = vector.broadcast %cst_5 : f32 to vector<16x128xf32>
    %8 = arith.maximumf %6, %7 : vector<16x128xf32>
    %9 = arith.truncf %8 : vector<16x128xf32> to vector<16x128xbf16>
    %c0_6 = arith.constant 0 : index
    %c0_7 = arith.constant 0 : index
    %10 = vector.load %arg4[%c0_6, %c0_7] : memref<128x128xbf16, #tpu.memory_space<vmem>>, vector<128x128xbf16>
    %cst_8 = arith.constant dense<0.000000e+00> : vector<16x128xf32>
    %11 = tpu.matmul %9, %10, %cst_8 {dimension_numbers = #tpu.dot_dimension_numbers<[1], [0], [0], [1], [0, 0, 1, 1], [], []>} : vector<16x128xbf16>, vector<128x128xbf16>, vector<16x128xf32> -> vector<16x128xf32>
    %c0_9 = arith.constant 0 : index
    %c0_10 = arith.constant 0 : index
    %12 = vector.load %arg5[%c0_9, %c0_10] : memref<1x128xf32, #tpu.memory_space<vmem>>, vector<1x128xf32>
    %13 = vector.broadcast %12 : vector<1x128xf32> to vector<16x128xf32>
    %14 = arith.addf %11, %13 : vector<16x128xf32>
    %cst_11 = arith.constant 0.000000e+00 : f32
    %15 = vector.broadcast %cst_11 : f32 to vector<16x128xf32>
    %16 = arith.maximumf %14, %15 : vector<16x128xf32>
    %17 = arith.truncf %16 : vector<16x128xf32> to vector<16x128xbf16>
    %c0_12 = arith.constant 0 : index
    %c0_13 = arith.constant 0 : index
    %18 = vector.load %arg6[%c0_12, %c0_13] : memref<128x4xbf16, #tpu.memory_space<vmem>>, vector<128x4xbf16>
    %cst_14 = arith.constant dense<0.000000e+00> : vector<16x4xf32>
    %19 = tpu.matmul %17, %18, %cst_14 {dimension_numbers = #tpu.dot_dimension_numbers<[1], [0], [0], [1], [0, 0, 1, 1], [], []>} : vector<16x128xbf16>, vector<128x4xbf16>, vector<16x4xf32> -> vector<16x4xf32>
    %c0_15 = arith.constant 0 : index
    %c0_16 = arith.constant 0 : index
    %20 = vector.load %arg7[%c0_15, %c0_16] : memref<1x4xf32, #tpu.memory_space<vmem>>, vector<1x4xf32>
    %21 = vector.broadcast %20 : vector<1x4xf32> to vector<16x4xf32>
    %22 = arith.addf %19, %21 : vector<16x4xf32>
    %c0_17 = arith.constant 0 : index
    %c0_18 = arith.constant 0 : index
    %23 = vector.load %arg8[%c0_17, %c0_18] : memref<16x4xf32, #tpu.memory_space<vmem>>, vector<16x4xf32>
    tpu.vector_store %arg8[%c0_17, %c0_18], %22 {strides = array<i32>} : memref<16x4xf32, #tpu.memory_space<vmem>>, vector<16x4xf32>,
    return
  }
  func.func @transform_0(%arg0: i32) -> (i32, i32) {
    %c0_i32 = arith.constant 0 : i32
    %c0_i32_0 = arith.constant 0 : i32
    return %arg0, %c0_i32 : i32, i32
  }
  func.func @transform_1(%arg0: i32) -> (i32, i32) {
    %c0_i32 = arith.constant 0 : i32
    %c0_i32_0 = arith.constant 0 : i32
    %c0_i32_1 = arith.constant 0 : i32
    return %c0_i32, %c0_i32_0 : i32, i32
  }
  func.func @transform_2(%arg0: i32) -> (i32, i32) {
    %c0_i32 = arith.constant 0 : i32
    %c0_i32_0 = arith.constant 0 : i32
    %c0_i32_1 = arith.constant 0 : i32
    return %c0_i32, %c0_i32_0 : i32, i32
  }
  func.func @transform_3(%arg0: i32) -> (i32, i32) {
    %c0_i32 = arith.constant 0 : i32
    %c0_i32_0 = arith.constant 0 : i32
    %c0_i32_1 = arith.constant 0 : i32
    return %c0_i32, %c0_i32_0 : i32, i32
  }
  func.func @transform_4(%arg0: i32) -> (i32, i32) {
    %c0_i32 = arith.constant 0 : i32
    %c0_i32_0 = arith.constant 0 : i32
    %c0_i32_1 = arith.constant 0 : i32
    return %c0_i32, %c0_i32_0 : i32, i32
  }
  func.func @transform_5(%arg0: i32) -> (i32, i32) {
    %c0_i32 = arith.constant 0 : i32
    %c0_i32_0 = arith.constant 0 : i32
    %c0_i32_1 = arith.constant 0 : i32
    return %c0_i32, %c0_i32_0 : i32, i32
  }
  func.func @transform_6(%arg0: i32) -> (i32, i32) {
    %c0_i32 = arith.constant 0 : i32
    %c0_i32_0 = arith.constant 0 : i32
    %c0_i32_1 = arith.constant 0 : i32
    return %c0_i32, %c0_i32_0 : i32, i32
  }
  func.func @transform_7(%arg0: i32) -> (i32, i32) {
    %c0_i32 = arith.constant 0 : i32
    %c0_i32_0 = arith.constant 0 : i32
    return %arg0, %c0_i32 : i32, i32
  }
}

</mosaic_0001>

<bundles_post_ra>
// kernel: actionnet_forward.1
= control target key start
LH: loop header
LB: loop body
LE: loop exit
PB: predicated region body
PF: predicated region fallthrough
CT: control target
= control target key end

     0   :  { %vm686_vm0 = vcmask 31744   ;;  %s1333_s0 = inlined_call_operand.vmem [shape: f32[8,768], index: 0, kind: input, shape index: {}]   ;;  %s1334_s1 = inlined_call_operand.vmem [shape: bf16[768,128], index: 1, kind: input, shape index: {}]   ;;  %s1335_s2 = inlined_call_operand.vmem [shape: f32[1,128], index: 2, kind: input, shape index: {}]   ;;  %s1336_s3 = inlined_call_operand.vmem [shape: bf16[128,128], index: 3, kind: input, shape index: {}]   ;;  %s1337_s4 = inlined_call_operand.vmem [shape: f32[1,128], index: 4, kind: input, shape index: {}]   ;;  %s1338_s5 = inlined_call_operand.vmem [shape: bf16[128,4], index: 5, kind: input, shape index: {}]   ;;  %s1339_s6 = inlined_call_operand.vmem [shape: f32[1,4], index: 6, kind: input, shape index: {}]   ;;  %s1340_s7 = inlined_call_operand.vmem [shape: f32[8,4], index: 7, kind: output, shape index: {}]  }
   0x1   :  { %v993_v0 = vld [vmem:[%s1334_s1 + $0x38] sm:$0xff]  ;;  %v992_v4 = vld [vmem:[%s1334_s1 + $0x30] sm:$0xff]  ;;  %v991_v8 = vld [vmem:[%s1334_s1 + $0x28] sm:$0xff] }
   0x2   :  { %v1001_v1 = vld [vmem:[%s1334_s1 + $0x78] sm:$0xff]  ;;  %432 = vmatpush.bf16.msra.mxu0 %v993_v0  ;;  %v1000_v5 = vld [vmem:[%s1334_s1 + $0x70] sm:$0xff]  ;;  %v999_v9 = vld [vmem:[%s1334_s1 + $0x68] sm:$0xff] }
   0x3   :  { %v1009_v2 = vld [vmem:[%s1334_s1 + $0xb8] sm:$0xff]  ;;  %446 = vmatpush.bf16.msra.mxu1 %v1001_v1  ;;  %v1008_v6 = vld [vmem:[%s1334_s1 + $0xb0] sm:$0xff]  ;;  %v1007_v10 = vld [vmem:[%s1334_s1 + $0xa8] sm:$0xff] }
   0x4   :  { %v1017_v3 = vld [vmem:[%s1334_s1 + $0xf8] sm:$0xff]  ;;  %460 = vmatpush.bf16.msra.mxu2 %v1009_v2  ;;  %v1016_v7 = vld [vmem:[%s1334_s1 + $0xf0] sm:$0xff]  ;;  %v1015_v11 = vld [vmem:[%s1334_s1 + $0xe8] sm:$0xff] }
   0x5   :  { %474 = vmatpush.bf16.msra.mxu3 %v1017_v3  ;;  %v990_v12 = vld [vmem:[%s1334_s1 + $0x20] sm:$0xff]  ;;  %v989_v16 = vld [vmem:[%s1334_s1 + $0x18] sm:$0xff]  ;;  %v988_v20 = vld [vmem:[%s1334_s1 + $0x10] sm:$0xff] }
   0x6   :  { %433 = vmatpush.bf16.msra.mxu0 %v992_v4  ;;  %v998_v13 = vld [vmem:[%s1334_s1 + $0x60] sm:$0xff]  ;;  %v997_v17 = vld [vmem:[%s1334_s1 + $0x58] sm:$0xff]  ;;  %v996_v21 = vld [vmem:[%s1334_s1 + $0x50] sm:$0xff] }
   0x7   :  { %447 = vmatpush.bf16.msra.mxu1 %v1000_v5  ;;  %v1006_v14 = vld [vmem:[%s1334_s1 + $0xa0] sm:$0xff]  ;;  %v1005_v18 = vld [vmem:[%s1334_s1 + $0x98] sm:$0xff]  ;;  %v1004_v22 = vld [vmem:[%s1334_s1 + $0x90] sm:$0xff] }
   0x8   :  { %461 = vmatpush.bf16.msra.mxu2 %v1008_v6  ;;  %v1014_v15 = vld [vmem:[%s1334_s1 + $0xe0] sm:$0xff]  ;;  %v1013_v19 = vld [vmem:[%s1334_s1 + $0xd8] sm:$0xff]  ;;  %v1012_v23 = vld [vmem:[%s1334_s1 + $0xd0] sm:$0xff] }
   0x9   :  { %475 = vmatpush.bf16.msra.mxu3 %v1016_v7  ;;  %v987_v24 = vld [vmem:[%s1334_s1 + $0x8] sm:$0xff]  ;;  %v986_v28 = vld [vmem:[%s1334_s1] sm:$0xff]  ;;  %v32_v31 = vld [vmem:[%s1333_s0 + $0x30] sm:$0xff] }
   0xa   :  { %434 = vmatpush.bf16.msra.mxu0 %v991_v8  ;;  %v995_v25 = vld [vmem:[%s1334_s1 + $0x48] sm:$0xff]  ;;  %v994_v29 = vld [vmem:[%s1334_s1 + $0x40] sm:$0xff]  ;;  %v33_v33 = vld [vmem:[%s1333_s0 + $0x38] sm:$0xff] }
   0xb   :  { %448 = vmatpush.bf16.msra.mxu1 %v999_v9  ;;  %v1003_v26 = vld [vmem:[%s1334_s1 + $0x88] sm:$0xff]  ;;  %v26_v30 = vld [vmem:[%s1333_s0] sm:$0xff]  ;;  %v1025_v34 = vld [vmem:[%s1334_s1 + $0x138] sm:$0xff] }
   0xc   :  { %462 = vmatpush.bf16.msra.mxu2 %v1007_v10  ;;  %v1011_v27 = vld [vmem:[%s1334_s1 + $0xc8] sm:$0xff]  ;;  %v1033_v35 = vld [vmem:[%s1334_s1 + $0x178] sm:$0xff]  ;;  %v1002_v36 = vld [vmem:[%s1334_s1 + $0x80] sm:$0xff]  ;;  %v38_v40 = vpack.c.bf16 %v32_v31, %v26_v30 }
   0xd   :  { %476 = vmatpush.bf16.msra.mxu3 %v1015_v11  ;;  %v27_v32 = vld [vmem:[%s1333_s0 + $0x8] sm:$0xff]  ;;  %v1010_v37 = vld [vmem:[%s1334_s1 + $0xc0] sm:$0xff]  ;;  %v28_v38 = vld [vmem:[%s1333_s0 + $0x10] sm:$0xff] }
   0xe   :  { %435 = vmatpush.bf16.msra.mxu0 %v990_v12  ;;  %v34_v39 = vld [vmem:[%s1333_s0 + $0x40] sm:$0xff]  ;;  %v29_v41 = vld [vmem:[%s1333_s0 + $0x18] sm:$0xff]  ;;  %v35_v42 = vld [vmem:[%s1333_s0 + $0x48] sm:$0xff]  ;;  %v39_v43 = vpack.c.bf16 %v33_v33, %v27_v32 }
   0xf   :  { %449 = vmatpush.bf16.msra.mxu1 %v998_v13  ;;  %v1024_v44 = vld [vmem:[%s1334_s1 + $0x130] sm:$0xff]  ;;  %v40_v46 = vpack.c.bf16 %v34_v39, %v28_v38  ;;  %v41_v47 = vpack.c.bf16 %v35_v42, %v29_v41  ;;  %v1023_v48 = vld [vmem:[%s1334_s1 + $0x128] sm:$0xff]  ;;  %v1022_v50 = vld [vmem:[%s1334_s1 + $0x120] sm:$0xff] }
  0x10   :  { %463 = vmatpush.bf16.msra.mxu2 %v1006_v14  ;;  %v1032_v45 = vld [vmem:[%s1334_s1 + $0x170] sm:$0xff]  ;;  %v1031_v49 = vld [vmem:[%s1334_s1 + $0x168] sm:$0xff]  ;;  %v1030_v51 = vld [vmem:[%s1334_s1 + $0x160] sm:$0xff] }
  0x11   :  { %477 = vmatpush.bf16.msra.mxu3 %v1014_v15  ;;  %v1021_v52 = vld [vmem:[%s1334_s1 + $0x118] sm:$0xff]  ;;  %v1020_v54 = vld [vmem:[%s1334_s1 + $0x110] sm:$0xff]  ;;  %v1019_v56 = vld [vmem:[%s1334_s1 + $0x108] sm:$0xff] }
  0x12   :  { %436 = vmatpush.bf16.msra.mxu0 %v989_v16  ;;  %v1029_v53 = vld [vmem:[%s1334_s1 + $0x158] sm:$0xff]  ;;  %v1028_v55 = vld [vmem:[%s1334_s1 + $0x150] sm:$0xff]  ;;  %v1027_v57 = vld [vmem:[%s1334_s1 + $0x148] sm:$0xff] }
  0x13   :  { %450 = vmatpush.bf16.msra.mxu1 %v997_v17  ;;  %v1018_v58 = vld [vmem:[%s1334_s1 + $0x100] sm:$0xff]  ;;  %v36_v61 = vld [vmem:[%s1333_s0 + $0x50] sm:$0xff]  ;;  %v31_v62 = vld [vmem:[%s1333_s0 + $0x28] sm:$0xff] }
  0x14   :  { %464 = vmatpush.bf16.msra.mxu2 %v1005_v18  ;;  %v1026_v59 = vld [vmem:[%s1334_s1 + $0x140] sm:$0xff]  ;;  %v37_v63 = vld [vmem:[%s1333_s0 + $0x58] sm:$0xff]  ;;  %v1040_v3 = vld [vmem:[%s1336_s3 + $0x30] sm:$0xff] }
  0x15   :  { %478 = vmatpush.bf16.msra.mxu3 %v1013_v19  ;;  %v30_v60 = vld [vmem:[%s1333_s0 + $0x20] sm:$0xff]  ;;  %v43_v1 = vpack.c.bf16 %v37_v63, %v31_v62  ;;  %v1041_v2 = vld [vmem:[%s1336_s3 + $0x38] sm:$0xff]  ;;  %v1039_v4 = vld [vmem:[%s1336_s3 + $0x28] sm:$0xff] }
  0x16   :  { %437 = vmatpush.bf16.msra.mxu0 %v988_v20  ;;  %v42_v0 = vpack.c.bf16 %v36_v61, %v30_v60  ;;  %v1038_v5 = vld [vmem:[%s1336_s3 + $0x20] sm:$0xff]  ;;  %v1037_v6 = vld [vmem:[%s1336_s3 + $0x18] sm:$0xff]  ;;  %v1036_v7 = vld [vmem:[%s1336_s3 + $0x10] sm:$0xff] }
  0x17   :  { %451 = vmatpush.bf16.msra.mxu1 %v996_v21  ;;  %v1035_v8 = vld [vmem:[%s1336_s3 + $0x8] sm:$0xff]  ;;  %v1034_v9 = vld [vmem:[%s1336_s3] sm:$0xff]  ;;  %v1049_v12 = vld [vmem:[%s1338_s5 + $0x38] sm:$0xff] }
  0x18   :  { %465 = vmatpush.bf16.msra.mxu2 %v1004_v22  ;;  %v1050_v13 = vld [vmem:[%s1335_s2] ss:$0 sm:$0xff]  ;;  %v1048_v14 = vld [vmem:[%s1338_s5 + $0x30] sm:$0xff]  ;;  %v1047_v17 = vld [vmem:[%s1338_s5 + $0x28] sm:$0xff] }
  0x19   :  { %479 = vmatpush.bf16.msra.mxu3 %v1012_v23  ;;  %v1046_v23 = vld [vmem:[%s1338_s5 + $0x20] sm:$0xff]  ;;  %v1045_v42 = vld [vmem:[%s1338_s5 + $0x18] sm:$0xff] }
  0x1a   :  { %438 = vmatpush.bf16.msra.mxu0 %v987_v24 }
  0x1b   :  { %452 = vmatpush.bf16.msra.mxu1 %v995_v25 }
  0x1c   :  { %466 = vmatpush.bf16.msra.mxu2 %v1003_v26 }
  0x1d   :  { %480 = vmatpush.bf16.msra.mxu3 %v1011_v27 }
  0x1e   :  { %439 = vmatpush.bf16.msra.mxu0 %v986_v28 }
  0x1f   :  { %453 = vmatpush.bf16.msra.mxu1 %v994_v29 }
  0x20   :  { %467 = vmatpush.bf16.msra.mxu2 %v1002_v36 }
  0x21   :  { %481 = vmatpush.bf16.msra.mxu3 %v1010_v37  ;;  %440 = vmatmul.bf16.vlgmr.msra.gmra.mxu0 %v38_v40 }
  0x22   :  { %488 = vmatpush.bf16.msrb.mxu0 %v1025_v34  ;;  %454 = vmatmul.bf16.vlgmr.msra.gmra.mxu1 %v39_v43  ;;  %v1044_v43 = vld [vmem:[%s1338_s5 + $0x10] sm:$0xff] }
  0x23   :  { %502 = vmatpush.bf16.msrb.mxu1 %v1033_v35  ;;  %468 = vmatmul.bf16.vlgmr.msra.gmra.mxu2 %v40_v46 }
  0x24   :  { %482 = vmatmul.bf16.vlgmr.msra.gmra.mxu3 %v41_v47  ;;  %587 = vmatpush.bf16.msrb.mxu2 %v1041_v2  ;;  %v1051_v47 = vld [vmem:[%s1337_s4] ss:$0 sm:$0xff] }
  0x25   :  { %672 = vmatpush.bf16.msrb.mxu3 %v1049_v12 }
  0x26   :  { %489 = vmatpush.bf16.msrb.mxu0 %v1024_v44  ;;  %v1043_v44 = vld [vmem:[%s1338_s5 + $0x8] sm:$0xff] }
  0x27   :  { %503 = vmatpush.bf16.msrb.mxu1 %v1032_v45  ;;  %v1042_v45 = vld [vmem:[%s1338_s5] sm:$0xff] }
  0x28   :  { %588 = vmatpush.bf16.msrb.mxu2 %v1040_v3 }
  0x29   :  { %673 = vmatpush.bf16.msrb.mxu3 %v1048_v14 }
  0x2a   :  { %490 = vmatpush.bf16.msrb.mxu0 %v1023_v48 }
  0x2b   :  { %504 = vmatpush.bf16.msrb.mxu1 %v1031_v49 }
  0x2c   :  { %589 = vmatpush.bf16.msrb.mxu2 %v1039_v4 }
  0x2d   :  { %674 = vmatpush.bf16.msrb.mxu3 %v1047_v17 }
  0x2e   :  { %491 = vmatpush.bf16.msrb.mxu0 %v1022_v50 }
  0x2f   :  { %505 = vmatpush.bf16.msrb.mxu1 %v1030_v51 }
  0x30   :  { %590 = vmatpush.bf16.msrb.mxu2 %v1038_v5 }
  0x31   :  { %675 = vmatpush.bf16.msrb.mxu3 %v1046_v23 }
  0x32   :  { %492 = vmatpush.bf16.msrb.mxu0 %v1021_v52 }
  0x33   :  { %506 = vmatpush.bf16.msrb.mxu1 %v1029_v53 }
  0x34   :  { %591 = vmatpush.bf16.msrb.mxu2 %v1037_v6 }
  0x35   :  { %676 = vmatpush.bf16.msrb.mxu3 %v1045_v42 }
  0x36   :  { %493 = vmatpush.bf16.msrb.mxu0 %v1020_v54  ;;  %v1052_v54 = vld [vmem:[%s1339_s6] ss:$0 sm:$0xff] }
  0x37   :  { %507 = vmatpush.bf16.msrb.mxu1 %v1028_v55 }
  0x38   :  { %592 = vmatpush.bf16.msrb.mxu2 %v1036_v7 }
  0x39   :  { %677 = vmatpush.bf16.msrb.mxu3 %v1044_v43 }
  0x3a   :  { %494 = vmatpush.bf16.msrb.mxu0 %v1019_v56 }
  0x3b   :  { %508 = vmatpush.bf16.msrb.mxu1 %v1027_v57 }
  0x3c   :  { %593 = vmatpush.bf16.msrb.mxu2 %v1035_v8 }
  0x3d   :  { %678 = vmatpush.bf16.msrb.mxu3 %v1043_v44 }
  0x3e   :  { %495 = vmatpush.bf16.msrb.mxu0 %v1018_v58 }
  0x3f   :  { %509 = vmatpush.bf16.msrb.mxu1 %v1026_v59 }
  0x40   :  { %594 = vmatpush.bf16.msrb.mxu2 %v1034_v9 }
  0x41   :  { %496 = vmatmul.bf16.vlgmr.msrb.gmra.mxu0 %v42_v0  ;;  %679 = vmatpush.bf16.msrb.mxu3 %v1042_v45 }
  0x42   :  { %510 = vmatmul.bf16.vlgmr.msrb.gmra.mxu1 %v43_v1 }
  0x9e   :  { %v441_v10 = vpop.f32.mrf.mxu0 }
  0x9f   :  { %v455_v11 = vpop.f32.mrf.mxu1  ;;  %v442_v16 = vadd.f32 %v1050_v13, %v441_v10 }
  0xa1   :  { %v456_v21 = vadd.f32 %v455_v11, %v442_v16 }
  0xa6   :  { %v469_v15 = vpop.f32.mrf.mxu2  ;;  %v443_v18 = vpop.f32.mrf.mxu0 }
  0xa7   :  { %v457_v19 = vpop.f32.mrf.mxu1  ;;  %v483_v20 = vpop.f32.mrf.mxu3  ;;  %v444_v22 = vadd.f32 %v1050_v13, %v443_v18  ;;  %v470_v24 = vadd.f32 %v469_v15, %v456_v21 }
  0xa9   :  { %v458_v25 = vadd.f32 %v457_v19, %v444_v22  ;;  %v484_v29 = vadd.f32 %v483_v20, %v470_v24 }
  0xae   :  { %v471_v26 = vpop.f32.mrf.mxu2 }
  0xaf   :  { %v472_v30 = vadd.f32 %v471_v26, %v458_v25  ;;  %v485_v31 = vpop.f32.mrf.mxu3 }
  0xb1   :  { %v486_v33 = vadd.f32 %v485_v31, %v472_v30 }
  0xbe   :  { %v497_v27 = vpop.f32.mrf.mxu0 }
  0xbf   :  { %v511_v28 = vpop.f32.mrf.mxu1  ;;  %v498_v32 = vadd.f32 %v497_v27, %v484_v29 }
  0xc1   :  { %v512_v35 = vadd.f32 %v511_v28, %v498_v32 }
  0xc3   :  { %v516_v39 = vmax.f32 %v512_v35, 0.0 }
  0xc6   :  { %v499_v34 = vpop.f32.mrf.mxu0 }
  0xc7   :  { %v500_v36 = vadd.f32 %v499_v34, %v486_v33  ;;  %v513_v37 = vpop.f32.mrf.mxu1 }
  0xc9   :  { %v514_v38 = vadd.f32 %v513_v37, %v500_v36 }
  0xcb   :  { %v517_v40 = vmax.f32 %v514_v38, 0.0 }
  0xcd   :  { %v518_v41 = vpack.c.bf16 %v517_v40, %v516_v39 }
  0xcf   :  { %595 = vmatmul.bf16.vlgmr.msrb.gmra.mxu2 %v518_v41 }
 0x152   :  { %v596_v46 = vpop.f32.mrf.mxu2 }
 0x153   :  { %v597_v48 = vadd.f32 %v1051_v47, %v596_v46 }
 0x155   :  { %v601_v51 = vmax.f32 %v597_v48, 0.0 }
 0x15a   :  { %v598_v49 = vpop.f32.mrf.mxu2 }
 0x15b   :  { %v599_v50 = vadd.f32 %v1051_v47, %v598_v49 }
 0x15d   :  { %v602_v52 = vmax.f32 %v599_v50, 0.0 }
 0x15f   :  { %v603_v53 = vpack.c.bf16 %v602_v52, %v601_v51 }
 0x161   :  { %680 = vmatmul.bf16.vlgmr.msrb.gmra.mxu3 %v603_v53 }
 0x1e4   :  { %v681_v55 = vpop.f32.mrf.mxu3 }
 0x1e5   :  { %v682_v56 = vadd.f32 %v1052_v54, %v681_v55 }
 0x1e7   :  { %687 = vst.msk [vmem:[#allocation2] sm:$0xff] %vm686_vm0, %v682_v56 }
 0x1ec   :  { %v683_v57 = vpop.f32.mrf.mxu3 }
 0x1ee   :  { %v719_v58 = vld [vmem:[#allocation2] sm:$0xff] }
 0x1ef   :  { %720 = vst [vmem:[%s1340_s7] sm:$0xff] %v719_v58 }

</bundles_post_ra>
